<compile_context>
chip_gen: v6e
topology: v6e:2x2x1
jax: 0.10.0
libtpu: 0.0.40
codegen_flags: <defaults>
</compile_context>

<pallas_src>
import functools

import jax
import jax.numpy as jnp
from jax.experimental import pallas as pl
from jax.experimental.pallas import tpu as pltpu


_LANE = 128
_IDENTITY = object()    # marker: layer is an identity on the data path


# ------------------------------ Pallas kernel -------------------------------

def _chain_kernel(x_ref, y_ref, *, fns):
    v = x_ref[...]
    for fn in fns:                       # fused per-element layer chain (cheap
        v = fn(v)                        # VPU work, hidden under the block DMA)
    y_ref[...] = v.astype(y_ref.dtype)


def _sublane_pack(in_dtype, out_dtype):
    """Sublane packing factor: 8 for 4-byte, 16 for 2-byte, 32 for 1-byte."""
    itemsize = min(jnp.dtype(in_dtype).itemsize, jnp.dtype(out_dtype).itemsize)
    return max(8, 32 // max(1, itemsize))


def _chip_caps():
    """Return (max per-array block bytes, prefer >=2 grid steps)."""
    try:
        kind = jax.devices()[0].device_kind.lower()
    except Exception:
        kind = ""
    if "v6" in kind or "trillium" in kind:
        return 4 << 20, False   # 128 MiB VMEM, single TC: biggest blocks
    if "v7" in kind:
        return 2 << 20, True    # 64 MiB VMEM, 2 TCs: keep the grid shardable
    if "v5" in kind:
        return 2 << 20, False   # stay inside the 16 MiB scoped-VMEM default
    return 2 << 20, True


def _pick_width(n):
    """Lane-dense width for a flat length-n array (multiple of 128)."""
    for width in (1024, 512, 256, _LANE):
        if n % width == 0:
            return width
    return None


def _pick_block_rows(rows, width, itemsize, pack, cap_bytes, prefer_multi):
    if rows < pack:
        return rows   # tiny tensor: full-extent block (always legal)
    cap_rows = max(pack, (cap_bytes // (width * itemsize)) // pack * pack)
    if prefer_multi and rows >= 2 * pack:
        # Keep at least 2 grid steps so both v7x TensorCores can stream.
        cap_rows = min(cap_rows, max(pack, (rows // 2) // pack * pack))
    best = max(pack, min(cap_rows, (rows // pack) * pack))
    # Prefer an exact divisor nearby (unmasked boundary stores) when cheap.
    if rows % pack == 0:
        br = best
        for _ in range(64):
            if br < pack:
                break
            if rows % br == 0:
                return br
            br -= pack
    return best   # non-divisible: Mosaic masks the last (boundary) block


@functools.lru_cache(maxsize=None)
def _build_tiled_runner(shape, in_dtype, out_dtype, rows, width, block_rows,
                        fns, donate):
    in_dtype = jnp.dtype(in_dtype)
    out_dtype = jnp.dtype(out_dtype)
    kernel = functools.partial(_chain_kernel, fns=fns)
    grid_len = pl.cdiv(rows, block_rows)

    in_block = block_rows * width * in_dtype.itemsize
    out_block = block_rows * width * out_dtype.itemsize
    # Double-buffered input + output blocks, plus headroom; never above 32 MiB.
    vmem_limit = int(min(32 << 20, max(16 << 20, 2 * (in_block + out_block) + (4 << 20))))

    n = rows * width
    cost = pl.CostEstimate(
        flops=n * max(1, len(fns)),
        transcendentals=0,
        bytes_accessed=n * (in_dtype.itemsize + out_dtype.itemsize),
    )

    same_dtype = in_dtype == out_dtype
    call = pl.pallas_call(
        kernel,
        out_shape=jax.ShapeDtypeStruct((rows, width), out_dtype),
        grid=(grid_len,),
        in_specs=[pl.BlockSpec((block_rows, width), lambda i: (i, 0))],
        out_specs=pl.BlockSpec((block_rows, width), lambda i: (i, 0)),
        input_output_aliases=({0: 0} if same_dtype else {}),
        compiler_params=pltpu.CompilerParams(
            dimension_semantics=("parallel",),
            vmem_limit_bytes=vmem_limit,
        ),
        cost_estimate=cost,
    )

    def run(x):
        y = call(x.reshape(rows, width))
        return y.reshape(shape)

    if donate and same_dtype:
        return jax.jit(run, donate_argnums=(0,))
    return jax.jit(run)


def _apply_elementwise_chain(x, fns, donate=False):
    """Apply a fused chain of per-element layer functions in ONE pass.

    Identity chains are a no-op (no HBM traffic at all).  Non-identity chains
    cost one HBM read + one (aliased, in-place when `donate`) HBM write total.
    """
    fns = tuple(f for f in fns if f is not _IDENTITY)
    if not fns or x.size == 0:
        return x

    x = jnp.asarray(x)
    in_dtype = jnp.dtype(x.dtype)
    out_dtype = jax.eval_shape(
        lambda v: functools.reduce(lambda a, f: f(a), fns, v),
        jax.ShapeDtypeStruct((), in_dtype),
    ).dtype

    n = x.size
    width = _pick_width(n)
    if width is None:
        # TODO(synk): ragged (non-128-divisible) element counts fall back to a
        # single fused jnp pass (XLA fuses the chain) instead of a Pallas
        # masked-tail kernel; avoids the whole-array-in-VMEM cliff.
        return jax.jit(lambda v: functools.reduce(lambda a, f: f(a), fns, v))(x)

    rows = n // width
    cap_bytes, prefer_multi = _chip_caps()
    itemsize = max(in_dtype.itemsize, jnp.dtype(out_dtype).itemsize)
    pack = _sublane_pack(in_dtype, out_dtype)
    block_rows = _pick_block_rows(rows, width, itemsize, pack, cap_bytes,
                                  prefer_multi)

    runner = _build_tiled_runner(tuple(x.shape), in_dtype, jnp.dtype(out_dtype),
                                 rows, width, block_rows, fns, bool(donate))
    return runner(x)


# ----------------------------- module framework -----------------------------

class Parameter:
    def __init__(self, data):
        self.shape = data.shape
        self.data = data
        self.grad = jnp.zeros_like(data)


class Module:
    def __init__(self):
        self.parameters = []

    def parameter(self, x):
        p = Parameter(x)
        self.parameters.append(p)
        return p

    def each_inner_parameter(self):
        yield from ()

    def each_parameter(self):
        yield from self.parameters
        yield from self.each_inner_parameter()

    def zero_grad(self):
        for p in self.each_parameter():
            p.grad = jnp.zeros_like(p.data)

    def forward(self, x, is_t):
        return x

    def __call__(self, x, is_t):
        return self.forward(x, is_t)

    def update_step(self, lr):
        for p in self.each_parameter():
            if p.grad is None:
                continue
            p.data = p.data - lr * p.grad

    # Fusion hook used by Sequence:
    #   * _IDENTITY  -> layer is a no-op on the data path (skip entirely)
    #   * callable   -> per-element jnp function to fuse into one Pallas pass
    #   * None       -> not fusable; Sequence calls layer.forward directly
    def elementwise_fn(self, is_t):
        return _IDENTITY


class Sequence(Module):
    def __init__(self, *layers):
        super().__init__()
        self.layers = layers

    def each_inner_parameter(self):
        for layer in self.layers:
            yield from layer.each_parameter()

    def forward(self, x, is_t):
        # Fuse runs of elementwise-fusable layers into a single Pallas pass;
        # identity layers are skipped outright; non-fusable layers are flushed
        # and called directly (spec behavior).  Only intermediates that this
        # forward owns are donated (in-place aliasing); the caller's input is
        # never donated.
        x_in = x
        pending = []

        def flush(cur):
            nonlocal pending
            if pending:
                cur = _apply_elementwise_chain(cur, pending,
                                               donate=(cur is not x_in))
                pending = []
            return cur

        for layer in self.layers:
            get_fn = getattr(layer, "elementwise_fn", None)
            fn = get_fn(is_t) if get_fn is not None else None
            if fn is _IDENTITY:
                continue
            if fn is not None:
                pending.append(fn)
            else:
                x = flush(x)
                x = layer.forward(x, is_t)
        return flush(x)

    # TODO(synk): backward() (reverse-mode chain over layers) not implemented —
    # this translation covers the forward pass only.


class _ScaleShift(Module):
    """Demo-only elementwise layer used to exercise the fused Pallas pass."""

    def __init__(self, scale, shift):
        super().__init__()
        self.scale = float(scale)
        self.shift = float(shift)
        s, b = self.scale, self.shift
        self._fn = lambda v: v * s + b     # cached -> stable jit cache key

    def forward(self, x, is_t):
        return x * self.scale + self.shift

    def elementwise_fn(self, is_t):
        return self._fn


if __name__ == "__main__":
    key = jax.random.PRNGKey(0)
    x = jax.random.normal(key, (2, 4, 16, 16), dtype=jnp.float32)  # NCHW

    # 1) Spec case: Sequence of plain Modules is an identity map.  The identity
    #    short-circuit means zero Pallas passes / zero HBM traffic.
    seq_id = Sequence(Module(), Module(), Module())
    y_id = jax.block_until_ready(seq_id(x, is_t=False))
    assert y_id.shape == x.shape and y_id.dtype == x.dtype
    assert bool(jnp.all(y_id == x))

    # 2) Exercise the fused Pallas streamer with a non-identity elementwise
    #    chain (two _ScaleShift layers fused into ONE pallas_call).
    ref = (x * 2.0 - 1.0) * 0.5 + 3.0          # computed before, x not donated
    seq = Sequence(Module(), _ScaleShift(2.0, -1.0), Module(),
                   _ScaleShift(0.5, 3.0), Module())
    y = jax.block_until_ready(seq(x, is_t=False))
    assert y.shape == x.shape and y.dtype == x.dtype
    assert bool(jnp.allclose(y, ref, rtol=1e-6, atol=1e-6))

    print("KERNEL_OK")
</pallas_src>

<mosaic_0001>
module attributes {stable_mosaic.version = 11 : i64} {
  func.func @_chain_kernel(%arg0: i32, %arg1: memref<2x1024xf32, #tpu.memory_space<vmem>>, %arg2: memref<2x1024xf32, #tpu.memory_space<vmem>>) attributes {dimension_semantics = [#tpu.dimension_semantics<parallel>], iteration_bounds = array<i64: 1>, scalar_prefetch = 0 : i64, scratch_operands = 0 : i64, tpu.core_type = #tpu.core_type<tc>, window_params = [{transform_indices = @transform_0, window_bounds = array<i64: 2, 1024>}, {transform_indices = @transform_1, window_bounds = array<i64: 2, 1024>}]} {
    %c0 = arith.constant 0 : index
    %c0_0 = arith.constant 0 : index
    %0 = vector.load %arg1[%c0, %c0_0] : memref<2x1024xf32, #tpu.memory_space<vmem>>, vector<2x1024xf32>
    %cst = arith.constant 2.000000e+00 : f32
    %1 = vector.broadcast %cst : f32 to vector<2x1024xf32>
    %2 = arith.mulf %0, %1 : vector<2x1024xf32>
    %cst_1 = arith.constant -1.000000e+00 : f32
    %3 = vector.broadcast %cst_1 : f32 to vector<2x1024xf32>
    %4 = arith.addf %2, %3 : vector<2x1024xf32>
    %cst_2 = arith.constant 5.000000e-01 : f32
    %5 = vector.broadcast %cst_2 : f32 to vector<2x1024xf32>
    %6 = arith.mulf %4, %5 : vector<2x1024xf32>
    %cst_3 = arith.constant 3.000000e+00 : f32
    %7 = vector.broadcast %cst_3 : f32 to vector<2x1024xf32>
    %8 = arith.addf %6, %7 : vector<2x1024xf32>
    %c0_4 = arith.constant 0 : index
    %c0_5 = arith.constant 0 : index
    %9 = vector.load %arg2[%c0_4, %c0_5] : memref<2x1024xf32, #tpu.memory_space<vmem>>, vector<2x1024xf32>
    tpu.vector_store %arg2[%c0_4, %c0_5], %8 {strides = array<i32>} : memref<2x1024xf32, #tpu.memory_space<vmem>>, vector<2x1024xf32>,
    return
  }
  func.func @transform_0(%arg0: i32) -> (i32, i32) {
    %c0_i32 = arith.constant 0 : i32
    %c0_i32_0 = arith.constant 0 : i32
    return %arg0, %c0_i32 : i32, i32
  }
  func.func @transform_1(%arg0: i32) -> (i32, i32) {
    %c0_i32 = arith.constant 0 : i32
    %c0_i32_0 = arith.constant 0 : i32
    return %arg0, %c0_i32 : i32, i32
  }
}

</mosaic_0001>

<bundles_post_ra>
// kernel: run.1
= control target key start
LH: loop header
LB: loop body
LE: loop exit
PB: predicated region body
PF: predicated region fallthrough
CT: control target
= control target key end

     0   :  { %s46_s0 = inlined_call_operand.vmem [shape: f32[2,1024], index: 0, kind: input, shape index: {}, may-alias: {0,1}]   ;;  %s47_s1 = inlined_call_operand.vmem [shape: f32[2,1024], index: 1, kind: output, shape index: {}, may-alias: {0,1}]  }
   0x1   :  { %v8_v0 = vld [vmem:[%s46_s0] sm:$0xff]  ;;  %v9_v1 = vld [vmem:[%s46_s0 + $0x8] sm:$0xff] }
   0x2   :  { %v10_v2 = vmul.f32 2.0, %v8_v0  ;;  %v11_v3 = vmul.f32 2.0, %v9_v1 }
   0x4   :  { %v12_v4 = vadd.f32 -1.0, %v10_v2  ;;  %v13_v5 = vadd.f32 -1.0, %v11_v3 }
   0x6   :  { %v14_v6 = vmul.f32 0.5, %v12_v4  ;;  %v15_v7 = vmul.f32 0.5, %v13_v5 }
   0x8   :  { %v16_v8 = vadd.f32 3.0, %v14_v6  ;;  %v17_v9 = vadd.f32 3.0, %v15_v7 }
   0xa   :  { %18 = vst [vmem:[%s47_s1] sm:$0xff] %v16_v8  ;;  %19 = vst [vmem:[%s47_s1 + $0x8] sm:$0xff] %v17_v9 }

</bundles_post_ra>
